<compile_context>
chip_gen: v6e
topology: v6e:2x2x1
jax: 0.10.0
libtpu: 0.0.40
codegen_flags: <defaults>
</compile_context>

<pallas_src>
import functools

import jax
import jax.numpy as jnp
from jax.experimental import pallas as pl
from jax.experimental.pallas import tpu as pltpu


def _round_up(v, m):
    return ((v + m - 1) // m) * m


# ----------------------------- Pallas kernel -------------------------------
def fused_gcn_kernel(a_ref, x_ref, w1_ref, b1_ref, w2_ref, b2_ref, o_ref,
                     *, assoc_ax_first_l1, assoc_ah_first_l2):
    a = a_ref[...]     # bf16 [Np, Np]
    x = x_ref[...]     # bf16 [Np, Fp]
    w1 = w1_ref[...]   # bf16 [Fp, Hp]
    w2 = w2_ref[...]   # bf16 [Hp, Op]

    # ---------------- layer 1: h = relu(A @ X @ W1 + b1) ----------------
    if assoc_ax_first_l1:
        # (A @ X) @ W1 — cheaper when padded F <= padded H
        ax = jnp.dot(a, x, preferred_element_type=jnp.bfloat16)
        h = jnp.dot(ax, w1, preferred_element_type=jnp.float32)
    else:
        # A @ (X @ W1)
        xw = jnp.dot(x, w1, preferred_element_type=jnp.bfloat16)
        h = jnp.dot(a, xw, preferred_element_type=jnp.float32)
    h = jnp.maximum(h + b1_ref[...], 0.0)      # f32 VPU (bias + ReLU)
    h_bf = h.astype(jnp.bfloat16)              # bf16 operand for the MXU

    # ---------------- layer 2: out = A @ h @ W2 + b2 ---------------------
    if assoc_ah_first_l2:
        ah = jnp.dot(a, h_bf, preferred_element_type=jnp.bfloat16)
        out = jnp.dot(ah, w2, preferred_element_type=jnp.float32)
    else:
        # A @ (h @ W2) — cheaper when padded H > padded O
        hw = jnp.dot(h_bf, w2, preferred_element_type=jnp.bfloat16)
        out = jnp.dot(a, hw, preferred_element_type=jnp.float32)

    # TODO(synk): on the large-N tiled path, write the output block as bf16
    # (only O of 128 lanes are valid) and cast after the slice to cut
    # writeback bytes; f32 is fine at these sizes.
    o_ref[...] = (out + b2_ref[...]).astype(o_ref.dtype)


# ----------------------- one-time (cached) preparation ----------------------
@functools.partial(jax.jit, static_argnames=("num_nodes", "n_pad"))
def build_norm_adj_padded(edge_index, num_nodes, n_pad):
    """Dense D^{-1/2}(A+I)D^{-1/2} scattered directly into an (n_pad, n_pad)
    f32 buffer (padded rows/cols stay zero), cast to bf16 once."""
    src = edge_index[0]
    dst = edge_index[1]
    loop = jnp.arange(num_nodes, dtype=edge_index.dtype)
    src = jnp.concatenate([src, loop])
    dst = jnp.concatenate([dst, loop])
    ones = jnp.ones(src.shape[0], jnp.float32)
    deg = jnp.zeros(num_nodes, jnp.float32).at[dst].add(ones)
    deg_inv_sqrt = jnp.where(deg > 0, jax.lax.rsqrt(deg), 0.0)
    norm = deg_inv_sqrt[src] * deg_inv_sqrt[dst]
    # out[dst] += norm * x[src]  =>  A_hat[dst, src] = norm
    a_hat = jnp.zeros((n_pad, n_pad), jnp.float32).at[dst, src].add(norm)
    return a_hat.astype(jnp.bfloat16)


@functools.partial(jax.jit, static_argnames=("f_p", "h_p", "o_p"))
def prepare_params(params, f_p, h_p, o_p):
    """Pad + cast weights/biases once; reuse across forward calls."""
    f, h = params["w1"].shape
    _, o = params["w2"].shape
    w1_p = jnp.pad(params["w1"], ((0, f_p - f), (0, h_p - h))).astype(jnp.bfloat16)
    w2_p = jnp.pad(params["w2"], ((0, h_p - h), (0, o_p - o))).astype(jnp.bfloat16)
    b1_p = jnp.pad(params["b1"], (0, h_p - h)).reshape(1, h_p)   # f32
    b2_p = jnp.pad(params["b2"], (0, o_p - o)).reshape(1, o_p)   # f32
    return w1_p, b1_p, w2_p, b2_p


# ------------------------------- forward pass --------------------------------
@functools.partial(jax.jit, static_argnames=("n", "o_dim", "assoc1", "assoc2"))
def gcn_forward_padded(x, a_p, w1_p, b1_p, w2_p, b2_p, *, n, o_dim,
                       assoc1, assoc2):
    n_p = a_p.shape[0]
    f = x.shape[1]
    f_p = w1_p.shape[0]
    o_p = w2_p.shape[1]

    # Per-call glue is only this pad+cast of the node features.
    x_p = jnp.pad(x, ((0, n_p - n), (0, f_p - f))).astype(jnp.bfloat16)

    kernel = functools.partial(
        fused_gcn_kernel,
        assoc_ax_first_l1=assoc1,
        assoc_ah_first_l2=assoc2,
    )

    # TODO(synk): for large N, replace this single-invocation fused path with
    # a row-tiled pipelined grid over A_hat: 256/512-row (and 256-K) tiles to
    # saturate the 256x256 MXU on v6e/v7x (128-multiples suffice on v5e), mark
    # the row axis "parallel" so v7x's 2 TensorCores split it, budget VMEM per
    # generation (<=~48 MiB scoped on v7x's 64 MiB, up to ~64-100 MiB on
    # v5e/v6e), and ultimately a scalar-prefetch CSR gather instead of dense A.
    out_p = pl.pallas_call(
        kernel,
        out_shape=jax.ShapeDtypeStruct((n_p, o_p), jnp.float32),
        in_specs=[pl.BlockSpec(memory_space=pltpu.MemorySpace.VMEM)] * 6,
        out_specs=pl.BlockSpec(memory_space=pltpu.MemorySpace.VMEM),
    )(a_p, x_p, w1_p, b1_p, w2_p, b2_p)

    return out_p[:n, :o_dim]


def glorot(key, shape):
    fan_in, fan_out = shape
    limit = jnp.sqrt(6.0 / (fan_in + fan_out))
    return jax.random.uniform(key, shape, jnp.float32, -limit, limit)


# --------------------------------- main --------------------------------------
if __name__ == "__main__":
    num_nodes = 16
    input_dim = 16
    hidden_dim = 32
    output_dim = 8

    key = jax.random.PRNGKey(0)
    k_x, k_w1, k_w2 = jax.random.split(key, 3)

    # node features
    x = jax.random.normal(k_x, (num_nodes, input_dim), jnp.float32)

    # deterministic bidirectional ring graph edge_index, shape [2, E]
    src = jnp.arange(num_nodes, dtype=jnp.int32)
    dst = (src + 1) % num_nodes
    edge_index = jnp.stack(
        [jnp.concatenate([src, dst]), jnp.concatenate([dst, src])], axis=0
    )

    params = {
        "w1": glorot(k_w1, (input_dim, hidden_dim)),
        "b1": jnp.zeros((hidden_dim,), jnp.float32),
        "w2": glorot(k_w2, (hidden_dim, output_dim)),
        "b2": jnp.zeros((output_dim,), jnp.float32),
    }

    # Padded, TPU-friendly extents: nodes/sublanes to 16 (bf16 vreg packing),
    # lanes to 128.
    n_p = _round_up(num_nodes, 16)
    f_p = _round_up(input_dim, 128)
    h_p = _round_up(hidden_dim, 128)
    o_p = _round_up(output_dim, 128)

    # One-time, cached across forward calls (edge_index and params static).
    a_p = build_norm_adj_padded(edge_index, num_nodes, n_p)          # bf16
    w1_p, b1_p, w2_p, b2_p = prepare_params(params, f_p, h_p, o_p)

    # Re-association decided on PADDED dims (padded zeros are real MXU work).
    assoc1 = f_p <= h_p   # (A@X)@W1 when padded F <= padded H
    assoc2 = h_p <= o_p   # (A@h)@W2 when padded H <= padded O, else A@(h@W2)

    out = gcn_forward_padded(
        x, a_p, w1_p, b1_p, w2_p, b2_p,
        n=num_nodes, o_dim=output_dim, assoc1=assoc1, assoc2=assoc2,
    )
    jax.block_until_ready(out)
    assert out.shape == (num_nodes, output_dim)
    print("KERNEL_OK")
</pallas_src>

<mosaic_0001>
module attributes {stable_mosaic.version = 11 : i64} {
  func.func private @main(%arg0: i32) attributes {dimension_semantics = [#tpu.dimension_semantics<core_parallel>], iteration_bounds = array<i64: 2>, tpu.core_type = #tpu.core_type<sc_scalar_subcore>, window_params = []} {
    return
  }
}

module attributes {stable_mosaic.version = 11 : i64} {
  func.func private @main(%arg0: i32) attributes {dimension_semantics = [#tpu.dimension_semantics<core_parallel>], iteration_bounds = array<i64: 2>, tpu.core_type = #tpu.core_type<sc_scalar_subcore>, window_params = []} {
    return
  }
}

</mosaic_0001>

<bundles_post_ra>
// kernel: mul.1
= control target key start
LH: loop header
LB: loop body
LE: loop exit
PB: predicated region body
PF: predicated region fallthrough
CT: control target
= control target key end

     0   :  { %s34_s0 = inlined_call_operand.vmem [shape: f32[48], index: 0, kind: input, shape index: {}]   ;;  %s35_s1 = inlined_call_operand.vmem [shape: f32[48], index: 1, kind: input, shape index: {}]   ;;  %s36_s2 = inlined_call_operand.vmem [shape: f32[48], index: 2, kind: output, shape index: {}]  }
   0x1   :  { %v3_v0 = vld [vmem:[%s34_s0] sm:$0x1] }
   0x2   :  { %v4_v1 = vld [vmem:[%s35_s1] sm:$0x1] }
   0x3   :  { %v7_v2 = vmul.f32 %v4_v1, %v3_v0 }
   0x5   :  { %9 = vst [vmem:[%s36_s2] sm:$0x1] %v7_v2 }

</bundles_post_ra>
